<compile_context>
chip_gen: v7x
topology: tpu7x:2x2x1
jax: 0.10.0
libtpu: 0.0.40
codegen_flags: <defaults>
</compile_context>

<pallas_src>
import functools

import jax
import jax.numpy as jnp
import numpy as np
from jax.experimental import pallas as pl
from jax.experimental.pallas import tpu as pltpu

_MIB = 1024 * 1024
_MASK = float(np.finfo(np.float32).min) * 0.5   # softmax mask value; exp() underflows to 0


def _round_up(x, m):
    return (x + m - 1) // m * m


def _vmem_cap_bytes():
    cap = 64 * _MIB                       # conservative default (v7x per-core VMEM)
    try:
        info = pltpu.get_tpu_info()
        cap = int(getattr(info, "vmem_capacity_bytes", cap))
    except Exception:                     # query unavailable -> keep conservative cap
        pass
    return cap


def _vmem_limit_bytes(weight_bytes, io_block_bytes, scratch_bytes=0):
    """Scoped-VMEM budget.

    Whole-array resident weights are single-buffered; pipelined in/out blocks
    are double-buffered; 25% slack covers compiler-internal scratch.  Ceiling
    is generation-aware: ~51 MiB on v7x (64 MiB parts), ~102 MiB on v5e/v6e
    (128 MiB parts).
    """
    need = int(weight_bytes + 2 * io_block_bytes + scratch_bytes)
    ceiling = int(_vmem_cap_bytes() * 0.8)
    return int(min(max(int(need * 1.25), 16 * _MIB), ceiling))


# ----------------------------------------------------------------------------
# In-kernel helpers (always f32 math)
# ----------------------------------------------------------------------------
def _erf(x):
    # Abramowitz & Stegun 7.1.26 rational approximation, |err| < 1.5e-7 vs the
    # exact erf (slight, documented deviation from torch.erf).  exp() and the
    # approximate reciprocal both run on the EUP, keeping the divide off the
    # VALU slot (GELU covers the largest elementwise tensor in the block).
    a1, a2, a3, a4, a5 = 0.254829592, -0.284496736, 1.421413741, -1.453152027, 1.061405429
    p = 0.3275911
    s = jnp.sign(x)
    ax = jnp.abs(x)
    t = pl.reciprocal(1.0 + p * ax, approx=True)
    poly = ((((a5 * t + a4) * t + a3) * t + a2) * t + a1) * t
    return s * (1.0 - poly * jnp.exp(-ax * ax))


def _gelu_exact(x):
    return 0.5 * x * (1.0 + _erf(x * 0.7071067811865476))


def _layernorm_f32(x, gamma, beta, eps=1e-5):
    mu = jnp.mean(x, axis=-1, keepdims=True)
    var = jnp.mean(jnp.square(x - mu), axis=-1, keepdims=True)
    return (x - mu) * jax.lax.rsqrt(var + eps) * gamma + beta   # rsqrt -> EUP


# ----------------------------------------------------------------------------
# Pallas kernels
# ----------------------------------------------------------------------------
def _proj_kernel(x_ref, w_ref, b_ref, o_ref):
    # (tm, token_dim) @ (token_dim, E) + (1, E)
    acc = jnp.dot(x_ref[...], w_ref[...], preferred_element_type=jnp.float32)
    o_ref[...] = (acc + b_ref[...].astype(jnp.float32)).astype(o_ref.dtype)


def _block_kernel(
    x_ref, wqkv_ref, wo_ref, g1_ref, bt1_ref, w1_ref, b1_ref, w2_ref, b2_ref,
    g2_ref, bt2_ref, o_ref, qkv_sc, h1_sc, *, head_num, batch_tile, seq_len,
):
    R, E = x_ref.shape                    # R = batch_tile * seq_len (folded M dim)
    dh = E // head_num
    cdt = wqkv_ref.dtype                  # matmul input dtype (f32 or bf16)

    x_f32 = x_ref[...].astype(jnp.float32)

    # --- fused QKV projection: ONE (R,E)@(E,3E) MXU matmul over all folded rows.
    # Columns are packed per head as contiguous [q|k|v] (3*dh wide); the
    # attention scale sqrt(dh) is already folded into the q columns at init.
    qkv_sc[...] = jnp.dot(
        x_ref[...].astype(cdt), wqkv_ref[...], preferred_element_type=jnp.float32
    ).astype(cdt)

    # --- block-diagonal mask: with several batch elements folded into the row
    # dimension, attention must not cross batch boundaries.  Built with iota
    # thresholds (no integer division); hoisted out of the head loop.
    if batch_tile > 1:
        ri = jax.lax.broadcasted_iota(jnp.int32, (R, R), 0)
        ci = jax.lax.broadcasted_iota(jnp.int32, (R, R), 1)
        row_b = jnp.zeros((R, R), jnp.int32)
        col_b = jnp.zeros((R, R), jnp.int32)
        for t in range(1, batch_tile):
            row_b = row_b + (ri >= t * seq_len).astype(jnp.int32)
            col_b = col_b + (ci >= t * seq_len).astype(jnp.int32)
        same_batch = row_b == col_b
    else:
        same_batch = None

    # --- per-head attention with a lane-dense full-E f32 accumulator (no
    # per-head masked sub-vreg ctx stores, no concat, no (S,E) ctx scratch).
    attn = jnp.zeros((R, E), jnp.float32)
    for h in range(head_num):                            # heads are few; unrolled
        slab = qkv_sc[:, h * 3 * dh:(h + 1) * 3 * dh]    # one contiguous slice/head
        q = slab[:, 0 * dh:1 * dh]                       # pre-scaled by sqrt(dh)
        k = slab[:, 1 * dh:2 * dh]
        v = slab[:, 2 * dh:3 * dh]
        energy = jax.lax.dot_general(
            q, k, (((1,), (1,)), ((), ())), preferred_element_type=jnp.float32)
        if same_batch is not None:
            energy = jnp.where(same_batch, energy, _MASK)
        energy = energy - jnp.max(energy, axis=-1, keepdims=True)
        p = jnp.exp(energy)
        # approx reciprocal on the EUP: ~1e-4 rel. error vs exact softmax;
        # set approx=False if bit-level closeness to the torch reference matters.
        p = p * pl.reciprocal(jnp.sum(p, axis=-1, keepdims=True), approx=True)
        ctx = jnp.dot(p.astype(cdt), v, preferred_element_type=jnp.float32)
        attn = attn + jnp.dot(ctx.astype(cdt), wo_ref[h],
                              preferred_element_type=jnp.float32)

    # residual + LN1
    x1 = _layernorm_f32(x_f32 + attn,
                        g1_ref[...].astype(jnp.float32),
                        bt1_ref[...].astype(jnp.float32))

    # --- MLP: Linear -> GELU(exact erf) -> Linear, folded over all R rows.
    # TODO(synk): at ViT-Base f32 scale on v7x (64 MiB VMEM), tile w1/w2 along
    # mlp_dim with an inner pipelined loop (or use bf16 weights); unnecessary
    # at these sizes.
    h1 = jnp.dot(x1.astype(cdt), w1_ref[...], preferred_element_type=jnp.float32)
    h1 = h1 + b1_ref[...].astype(jnp.float32)
    h1_sc[...] = _gelu_exact(h1).astype(cdt)
    h2 = jnp.dot(h1_sc[...], w2_ref[...], preferred_element_type=jnp.float32)
    h2 = h2 + b2_ref[...].astype(jnp.float32)

    # residual + LN2
    x2 = _layernorm_f32(x1 + h2,
                        g2_ref[...].astype(jnp.float32),
                        bt2_ref[...].astype(jnp.float32))
    o_ref[...] = x2.astype(o_ref.dtype)


# ----------------------------------------------------------------------------
# Pallas wrappers
# ----------------------------------------------------------------------------
def proj_pallas(x2d, w, b):
    """Patch projection with batch folded into the matmul M dimension."""
    M, D = x2d.shape
    E = w.shape[1]
    tm = min(512, _round_up(M, 8))   # memory-bound: large tiles (~85% roofline at 512)
    M_pad = _round_up(M, tm)
    if M_pad != M:
        x2d = jnp.pad(x2d, ((0, M_pad - M), (0, 0)))

    weight_bytes = (int(np.prod(w.shape)) + int(np.prod(b.shape))) * w.dtype.itemsize
    io_bytes = tm * (D + E) * x2d.dtype.itemsize              # one in + one out block
    vmem_limit = _vmem_limit_bytes(weight_bytes, io_bytes)

    out = pl.pallas_call(
        _proj_kernel,
        out_shape=jax.ShapeDtypeStruct((M_pad, E), x2d.dtype),
        grid=(M_pad // tm,),
        in_specs=[
            pl.BlockSpec((tm, D), lambda i: (i, 0)),
            pl.BlockSpec(memory_space=pltpu.MemorySpace.VMEM),   # weights: single-buffered
            pl.BlockSpec(memory_space=pltpu.MemorySpace.VMEM),
        ],
        out_specs=pl.BlockSpec((tm, E), lambda i: (i, 0)),
        compiler_params=pltpu.CompilerParams(
            dimension_semantics=("parallel",), vmem_limit_bytes=vmem_limit),
    )(x2d, w, b.reshape(1, E))
    return out[:M]


def _pick_batch_tile(B, S):
    """Batch elements folded into the matmul M dimension per grid step.

    The (Bt*S, E) in/out block must be sublane-aligned (Bt*S % 8 == 0) or cover
    the whole folded array (Bt == B).  Row count is capped so the (R, R)
    attention-energy tile and scratch stay bounded.
    """
    max_rows = 512
    if B * S <= max_rows:
        return B                          # whole batch in one grid step
    best = B                              # whole array is always a legal block
    for bt in range(1, B):
        if B % bt == 0 and (bt * S) % 8 == 0 and bt * S <= max_rows:
            best = bt                     # largest aligned divisor under the cap
    return best


def block_pallas(x, blk, head_num, mlp_dim, batch_tile):
    B, S, E = x.shape
    Bt = batch_tile
    assert B % Bt == 0
    rows = Bt * S
    cdt = blk["wqkv"].dtype

    x2d = x.reshape(B * S, E)            # fold batch into the matmul M dimension

    kern = functools.partial(_block_kernel, head_num=head_num,
                             batch_tile=Bt, seq_len=S)

    weight_names = ("wqkv", "wo", "ln1_g", "ln1_b", "w1", "b1", "w2", "b2",
                    "ln2_g", "ln2_b")
    weight_bytes = sum(int(np.prod(blk[n].shape)) * blk[n].dtype.itemsize
                       for n in weight_names)
    io_bytes = 2 * rows * E * x.dtype.itemsize                   # in + out block
    scratch_bytes = rows * (3 * E + mlp_dim) * jnp.dtype(cdt).itemsize
    vmem_limit = _vmem_limit_bytes(weight_bytes, io_bytes, scratch_bytes)

    out = pl.pallas_call(
        kern,
        out_shape=jax.ShapeDtypeStruct((B * S, E), x.dtype),
        grid=(B // Bt,),
        in_specs=[pl.BlockSpec((rows, E), lambda i: (i, 0))]
        + [pl.BlockSpec(memory_space=pltpu.MemorySpace.VMEM) for _ in weight_names],
        out_specs=pl.BlockSpec((rows, E), lambda i: (i, 0)),
        scratch_shapes=[
            pltpu.VMEM((rows, 3 * E), cdt),     # fused qkv, per-head [q|k|v] packing
            pltpu.VMEM((rows, mlp_dim), cdt),   # GELU(MLP hidden)
        ],
        compiler_params=pltpu.CompilerParams(
            # TODO(synk): on v7x (2 TensorCores) use pltpu.CORE_PARALLEL on this
            # axis (keeping B//Bt a multiple of 2) to split batch blocks across
            # cores; at the demo size the whole batch is one grid step anyway.
            dimension_semantics=("parallel",),
            vmem_limit_bytes=vmem_limit,
        ),
    )(x2d, blk["wqkv"], blk["wo"], blk["ln1_g"], blk["ln1_b"],
      blk["w1"], blk["b1"], blk["w2"], blk["b2"], blk["ln2_g"], blk["ln2_b"])
    return out.reshape(B, S, E)


# ----------------------------------------------------------------------------
# Parameter init (deterministic, shapes follow the PyTorch __init__)
# ----------------------------------------------------------------------------
def init_params(key, cfg):
    E = cfg["embedding_dim"]
    hn = cfg["head_num"]
    dh = E // hn
    M = cfg["mlp_dim"]
    P = cfg["patch_dim"]
    C = cfg["in_channels"]
    token_dim = C * P * P
    num_tokens = (cfg["img_dim"] // P) ** 2
    dtype = cfg.get("dtype", jnp.float32)   # use jnp.bfloat16 on v6e/v7x for 2x MXU / half DMA

    keys = iter(jax.random.split(key, 8 + 4 * cfg["block_num"]))
    sc = 0.02

    # torch rearrange 'b t (d k h) -> k b h t d': original column = d*3*hn + k*hn + h.
    # Repack the fused qkv weight so each head's [q|k|v] is one contiguous 3*dh
    # column block (single lane-slice per head in-kernel), and fold the
    # attention scale sqrt(dh) (the source MULTIPLIES by it) into the q columns.
    perm = np.empty((3 * E,), np.int64)
    colscale = np.ones((1, 3 * E), np.float32)
    scale = float(dh ** 0.5)
    n = 0
    for h in range(hn):
        for k in range(3):
            for d in range(dh):
                perm[n] = d * 3 * hn + k * hn + h
                if k == 0:
                    colscale[0, n] = scale
                n += 1

    params = {
        "proj_w": (sc * jax.random.normal(next(keys), (token_dim, E))).astype(dtype),
        "proj_b": (sc * jax.random.normal(next(keys), (E,))).astype(dtype),
        "embedding": jax.random.uniform(next(keys), (num_tokens + 1, E)).astype(dtype),
        "cls_token": jax.random.normal(next(keys), (1, 1, E)).astype(dtype),
        "head_w": (sc * jax.random.normal(next(keys), (E, cfg["num_classes"]))).astype(jnp.float32),
        "head_b": (sc * jax.random.normal(next(keys), (cfg["num_classes"],))).astype(jnp.float32),
        "blocks": [],
    }

    for _ in range(cfg["block_num"]):
        w_qkv = sc * jax.random.normal(next(keys), (E, 3 * E), jnp.float32)
        w_o = sc * jax.random.normal(next(keys), (E, E), jnp.float32)
        blk = {
            "wqkv": (w_qkv[:, perm] * colscale).astype(dtype),        # (E, 3E) packed
            "wo": w_o.reshape(hn, dh, E).astype(dtype),               # per-head out proj
            "ln1_g": jnp.ones((1, E), dtype),
            "ln1_b": jnp.zeros((1, E), dtype),
            "w1": (sc * jax.random.normal(next(keys), (E, M))).astype(dtype),
            "b1": jnp.zeros((1, M), dtype),
            "w2": (sc * jax.random.normal(next(keys), (M, E))).astype(dtype),
            "b2": jnp.zeros((1, E), dtype),
            "ln2_g": jnp.ones((1, E), dtype),
            "ln2_b": jnp.zeros((1, E), dtype),
        }
        params["blocks"].append(blk)
    return params


# ----------------------------------------------------------------------------
# Full forward pass
# ----------------------------------------------------------------------------
def vit_forward(x, params, cfg):
    B, C, H, W = x.shape
    P = cfg["patch_dim"]
    gh, gw = H // P, W // P
    E = cfg["embedding_dim"]
    dtype = params["proj_w"].dtype

    # einops 'b c (px x) (py y) -> b (x y) (px py c)'  (px = py = patch_dim)
    patches = (
        x.reshape(B, C, P, gh, P, gw)
        .transpose(0, 3, 5, 2, 4, 1)
        .reshape(B, gh * gw, P * P * C)
    ).astype(dtype)

    proj = proj_pallas(
        patches.reshape(B * gh * gw, -1), params["proj_w"], params["proj_b"]
    ).reshape(B, gh * gw, E)
    cls = jnp.broadcast_to(params["cls_token"], (B, 1, E)).astype(dtype)
    seq = jnp.concatenate([cls, proj], axis=1)                             # (B, T+1, E)
    seq = seq + params["embedding"][: gh * gw + 1, :][None].astype(dtype)
    # dropout: inference-mode identity

    S = gh * gw + 1
    Bt = _pick_batch_tile(B, S)
    for blk in params["blocks"]:
        seq = block_pallas(seq, blk, cfg["head_num"], cfg["mlp_dim"], Bt)

    if cfg["classification"]:
        # tiny GEMV with non-lane-aligned num_classes -> plain JAX (per perf review)
        cls_tok = seq[:, 0, :].astype(jnp.float32)
        return cls_tok @ params["head_w"] + params["head_b"]
    return seq[:, 1:, :]


# ----------------------------------------------------------------------------
if __name__ == "__main__":
    cfg = dict(
        img_dim=16,
        in_channels=4,
        embedding_dim=32,
        head_num=4,
        mlp_dim=64,
        block_num=2,
        patch_dim=4,
        classification=True,
        num_classes=1,
        dtype=jnp.float32,   # jnp.bfloat16 recommended on v6e/v7x (f32 accumulation kept)
    )

    root = jax.random.PRNGKey(0)
    k_params, k_x = jax.random.split(root)
    params = init_params(k_params, cfg)
    x = jax.random.normal(k_x, (2, cfg["in_channels"], cfg["img_dim"], cfg["img_dim"]), jnp.float32)

    out = jax.block_until_ready(vit_forward(x, params, cfg))

    assert out.shape == (2, cfg["num_classes"]), out.shape
    assert bool(jnp.all(jnp.isfinite(out)))
    print("KERNEL_OK")
</pallas_src>

<mosaic_0001>
module attributes {stable_mosaic.version = 11 : i64} {
  func.func @_proj_kernel(%arg0: i32, %arg1: memref<32x64xf32, #tpu.memory_space<vmem>>, %arg2: memref<64x32xf32, #tpu.memory_space<vmem>>, %arg3: memref<1x32xf32, #tpu.memory_space<vmem>>, %arg4: memref<32x32xf32, #tpu.memory_space<vmem>>) attributes {dimension_semantics = [#tpu.dimension_semantics<parallel>], iteration_bounds = array<i64: 1>, scalar_prefetch = 0 : i64, scratch_operands = 0 : i64, tpu.core_type = #tpu.core_type<tc>, window_params = [{transform_indices = @transform_0, window_bounds = array<i64: 32, 64>}, {pipeline_mode = #tpu.pipeline_mode<synchronous>, transform_indices = @transform_1, window_bounds = array<i64: 64, 32>}, {pipeline_mode = #tpu.pipeline_mode<synchronous>, transform_indices = @transform_2, window_bounds = array<i64: 1, 32>}, {transform_indices = @transform_3, window_bounds = array<i64: 32, 32>}]} {
    %c0 = arith.constant 0 : index
    %c0_0 = arith.constant 0 : index
    %0 = vector.load %arg1[%c0, %c0_0] : memref<32x64xf32, #tpu.memory_space<vmem>>, vector<32x64xf32>
    %c0_1 = arith.constant 0 : index
    %c0_2 = arith.constant 0 : index
    %1 = vector.load %arg2[%c0_1, %c0_2] : memref<64x32xf32, #tpu.memory_space<vmem>>, vector<64x32xf32>
    %cst = arith.constant dense<0.000000e+00> : vector<32x32xf32>
    %2 = tpu.matmul %0, %1, %cst {dimension_numbers = #tpu.dot_dimension_numbers<[1], [0], [0], [1], [0, 0, 1, 1], [], []>} : vector<32x64xf32>, vector<64x32xf32>, vector<32x32xf32> -> vector<32x32xf32>
    %c0_3 = arith.constant 0 : index
    %c0_4 = arith.constant 0 : index
    %3 = vector.load %arg3[%c0_3, %c0_4] : memref<1x32xf32, #tpu.memory_space<vmem>>, vector<1x32xf32>
    %4 = vector.broadcast %3 : vector<1x32xf32> to vector<32x32xf32>
    %5 = arith.addf %2, %4 : vector<32x32xf32>
    %c0_5 = arith.constant 0 : index
    %c0_6 = arith.constant 0 : index
    %6 = vector.load %arg4[%c0_5, %c0_6] : memref<32x32xf32, #tpu.memory_space<vmem>>, vector<32x32xf32>
    tpu.vector_store %arg4[%c0_5, %c0_6], %5 {strides = array<i32>} : memref<32x32xf32, #tpu.memory_space<vmem>>, vector<32x32xf32>,
    return
  }
  func.func @transform_0(%arg0: i32) -> (i32, i32) {
    %c0_i32 = arith.constant 0 : i32
    %c0_i32_0 = arith.constant 0 : i32
    return %arg0, %c0_i32 : i32, i32
  }
  func.func @transform_1(%arg0: i32) -> (i32, i32) {
    %c0_i32 = arith.constant 0 : i32
    %c0_i32_0 = arith.constant 0 : i32
    %c0_i32_1 = arith.constant 0 : i32
    return %c0_i32, %c0_i32_0 : i32, i32
  }
  func.func @transform_2(%arg0: i32) -> (i32, i32) {
    %c0_i32 = arith.constant 0 : i32
    %c0_i32_0 = arith.constant 0 : i32
    %c0_i32_1 = arith.constant 0 : i32
    return %c0_i32, %c0_i32_0 : i32, i32
  }
  func.func @transform_3(%arg0: i32) -> (i32, i32) {
    %c0_i32 = arith.constant 0 : i32
    %c0_i32_0 = arith.constant 0 : i32
    return %arg0, %c0_i32 : i32, i32
  }
}

</mosaic_0001>

<bundles_post_ra>
// kernel: tpu_custom_call.1
= control target key start
LH: loop header
LB: loop body
LE: loop exit
PB: predicated region body
PF: predicated region fallthrough
CT: control target
= control target key end

     0   :  { %vm34_vm0 = vcmask 523264   ;;  %s321_s0 = inlined_call_operand.vmem [shape: f32[32,64], index: 0, kind: input, shape index: {}]   ;;  %s322_s1 = inlined_call_operand.vmem [shape: f32[64,32], index: 1, kind: input, shape index: {}]   ;;  %s323_s2 = inlined_call_operand.vmem [shape: f32[1,32], index: 2, kind: input, shape index: {}]   ;;  %s324_s3 = inlined_call_operand.hbm [shape: f32[32,32], index: 3, kind: output, shape index: {}]  }
   0x1   :  { %v19_v0 = vld [vmem:[%s322_s1] sm:$0xff]  ;;  %v20_v1 = vld [vmem:[%s322_s1 + $0x8] sm:$0xff]  ;;  %v21_v2 = vld [vmem:[%s322_s1 + $0x10] sm:$0xff] }
   0x2   :  { %v192_v3 = vpack.c.bf16 %v20_v1, %v19_v0  ;;  %v22_v4 = vld [vmem:[%s322_s1 + $0x18] sm:$0xff]  ;;  %v23_v6 = vld [vmem:[%s322_s1 + $0x20] sm:$0xff]  ;;  %v24_v7 = vld [vmem:[%s322_s1 + $0x28] sm:$0xff] }
   0x3   :  { %v196_v5 = vpack.c.bf16 %v22_v4, %v21_v2  ;;  %v15_v8 = vld [vmem:[%s321_s0] sm:$0xff]  ;;  %v17_v9 = vld [vmem:[%s321_s0 + $0x10] sm:$0xff] }
   0x4   :  { %193 = vmatprep.subr.bf16.mxu0 %v192_v3  ;;  %208 = vmatprep.subr.bf16.mxu1 %v192_v3 }
   0x5   :  { %195 = vmatpush3.bf16.msra.mxu0 %v192_v3  ;;  %212 = vmatpush3.bf16.msra.mxu1 %v192_v3 }
   0x6   :  { %8 = vsyncpa [#allocation3], 0  ;;  %197 = vmatprep.subr.bf16.mxu0 %v196_v5  ;;  %209 = vmatprep.subr.bf16.mxu1 %v196_v5  ;;  %v200_v10 = vpack.c.bf16 %v24_v7, %v23_v6  ;;  %v25_v11 = vld [vmem:[%s322_s1 + $0x30] sm:$0xff]  ;;  %v26_v12 = vld [vmem:[%s322_s1 + $0x38] sm:$0xff]  ;;  %s243_s10 = smov [#allocation2]   ;;  %vm132_vm1 = vcmask 261120  }
   0x7   :  { %186 = vmatprep.mubr.msk.f32.mxu0 %vm34_vm0, %v15_v8  ;;  %189 = vmatprep.mubr.msk.f32.mxu1 %vm34_vm0, %v17_v9  ;;  %v204_v13 = vpack.c.bf16 %v26_v12, %v25_v11  ;;  %v16_v14 = vld [vmem:[%s321_s0 + $0x8] sm:$0xff]  ;;  %v18_v15 = vld [vmem:[%s321_s0 + $0x18] sm:$0xff]  ;;  %v153_v16 = vld [vmem:[%s323_s2] ss:$0 sm:$0xff]  ;;  %s142_s11 = sshll.u32 %s243_s10, 4  ;;  %s143_s11 = int_to_ptr.vmem [resolvable:$true] %s142_s11 }
   0x8   :  { %s219_s0 = scalar_lea.vmem %s143_s11, 512  ;;  %p224_p1 = scmp.lt.s32.totalorder %s143_s11, %s143_s11 }
   0x9   :  { %199 = vmatpush3.bf16.msra.mxu0 %v196_v5  ;;  %213 = vmatpush3.bf16.msra.mxu1 %v196_v5  ;;  %p220_p0 = scmp.ne.s32.totalorder %s143_s11, %s219_s0  ;;  %p225_p2 = scmp.lt.s32.totalorder %s219_s0, %s219_s0 }
   0xa   :  { %201 = vmatprep.subr.bf16.mxu0 %v200_v10  ;;  %210 = vmatprep.subr.bf16.mxu1 %v200_v10 }
   0xb   :  { %p226_p3 = por %p225_p2, %p224_p1 }
   0xd   :  { %203 = vmatpush3.bf16.msra.mxu0 %v200_v10  ;;  %214 = vmatpush3.bf16.msra.mxu1 %v200_v10  ;;  %p227_p4 = pnand %p226_p3, %p220_p0 }
   0xe   :  { %205 = vmatprep.subr.bf16.mxu0 %v204_v13  ;;  %211 = vmatprep.subr.bf16.mxu1 %v204_v13 }
  0x11   :  { %207 = vmatpush3.bf16.msra.mxu0 %v204_v13  ;;  %215 = vmatpush3.bf16.msra.mxu1 %v204_v13 }
  0x14   :  { %187 = vmatmul.mubr.msk.f32.vlgmr.msra.gmra.mrb[0].mxu0 %vm34_vm0, %v16_v14  ;;  %190 = vmatmul.mubr.msk.f32.vlgmr.msra.gmra.mrb[0].mxu1 %vm34_vm0, %v18_v15 }
  0xe7   :  { %v188_v17 = vpop.f32.mrb[0].mxu0  ;;  %v191_v18 = vpop.f32.mrb[0].mxu1 }
  0xe8   :  { %v119_v19 = vadd.f32 %v188_v17, %v153_v16  ;;  %v129_v20 = vadd.f32 %v191_v18, %v153_v16  ;;  %v113_v21 = vpop.f32.mrb[1].mxu0  ;;  %v123_v22 = vpop.f32.mrb[1].mxu1 }
  0xe9   :  { %v114_v23 = vadd.f32 %v153_v16, %v113_v21  ;;  %v124_v24 = vadd.f32 %v153_v16, %v123_v22 }
  0xea   :  { %134 = vst.msk [vmem:[#allocation2 + $0x8] sm:$0xff] %vm132_vm1, %v119_v19  ;;  %136 = vst.msk [vmem:[#allocation2 + $0x18] sm:$0xff] %vm132_vm1, %v129_v20 }
  0xeb   :  { %133 = vst.msk [vmem:[#allocation2] sm:$0xff] %vm132_vm1, %v114_v23  ;;  %135 = vst.msk [vmem:[#allocation2 + $0x10] sm:$0xff] %vm132_vm1, %v124_v24 }
  0xec   :  { %230 = shalt.err (!%p227_p4)
}
  0xed   :  { %s231_s13 = scalar_lea.hbm %s324_s3, 512 }
  0xee   :  { %p232_p5 = scmp.ne.s32.totalorder %s324_s3, %s231_s13  ;;  %p235_p6 = scmp.lt.u32.totalorder %s231_s13, %s324_s3 }
  0xf0   :  { %p237_p7 = pnand %p235_p6, %p232_p5 }
  0xf2   :  { %240 = shalt.err (!%p237_p7)
}
  0xf3   :  { %s244_s18 = smov 128   ;;  %s245_s19 = smov 8  }
  0xf4   :  { %148 = dma.vmem_to_hbm [thread:$0]  %s143_s11, 512, %s324_s3, [#allocation3], %s244_s18, %s244_s18, %s245_s19  }
  0xf5   :  { %241 = dma.done.wait [#allocation3], 512  }
  0xf6   :  { %242 = vsyncadd [#allocation3], 4294966784 }
  0xf7   :  { %152 = vsyncpa [#allocation3], 1 }

</bundles_post_ra>
